<compile_context>
chip_gen: v5e
topology: v5e:2x2
jax: 0.10.0
libtpu: 0.0.40
codegen_flags: <defaults>
</compile_context>

<pallas_src>
import jax
import jax.numpy as jnp
import numpy as np
from jax import lax
from jax.experimental import pallas as pl
from jax.experimental.pallas import tpu as pltpu


# -----------------------------------------------------------------------------
# Pallas kernel: one (batch b, lane tile t) block of (C, TN) columns
# -----------------------------------------------------------------------------
def vote_kernel(feats_ref, w1_ref, b1_ref, w2_ref, b2_ref, w3_ref, b3_ref,
                vf_ref, off_ref):
    C = vf_ref.shape[0]
    cdt = w1_ref.dtype                       # MXU operand dtype (bf16 or f32)

    feats = feats_ref[...]                   # (C, TN), cdt

    # vote_conv[0]: Conv1d(k=1) + BN1d (folded) + ReLU  (bias/ReLU in f32)
    x = jnp.dot(w1_ref[...], feats, preferred_element_type=jnp.float32)
    x = jnp.maximum(x + b1_ref[...], 0.0)

    # vote_conv[1]: Conv1d(k=1) + BN1d (folded) + ReLU
    x = jnp.dot(w2_ref[...], x.astype(cdt), preferred_element_type=jnp.float32)
    x = jnp.maximum(x + b2_ref[...], 0.0)

    # conv_out (rows reordered: [offset(3) | pad(5) | res_feats(C) | pad])
    votes = jnp.dot(w3_ref[...], x.astype(cdt), preferred_element_type=jnp.float32)
    votes = votes + b3_ref[...]

    off_ref[...] = votes[:3, :]              # (3, TN)

    res = votes[8:8 + C, :]                  # 8-sublane-aligned slice start
    vf = feats.astype(jnp.float32) + res     # vote_feats = seed_feats + res
    sumsq = jnp.sum(vf * vf, axis=0, keepdims=True)          # (1, TN)
    vf_ref[...] = (vf * lax.rsqrt(sumsq + 1e-12)).astype(vf_ref.dtype)


# -----------------------------------------------------------------------------
# Wrapper
# -----------------------------------------------------------------------------
def _round_up(x, m):
    return m * ((x + m - 1) // m)


def vote_module_forward(seed_points, seed_feats, params, *,
                        lane_tile=2048, use_bf16=True, out_dtype=jnp.float32):
    """seed_points: (B, N, 3), seed_feats: (B, C, N) ->
    (vote_points (B, M, 3), vote_feats (B, C, M), offset (B, 3, M)), M = N."""
    B, N, _ = seed_points.shape
    _, C, n2 = seed_feats.shape
    assert n2 == N
    w1, b1, w2, b2, w3, b3 = params
    c1, c2 = w1.shape[0], w2.shape[0]
    assert w3.shape[0] == 3 + C              # with_res_feat=True, vote_per_seed=1

    cdt = jnp.bfloat16 if use_bf16 else jnp.float32

    # conv_out row reorder + sublane padding: [offset(3)|pad(5)|res(C)|pad->Cp]
    Cp = _round_up(C, 8)
    w3p = jnp.concatenate([w3[:3], jnp.zeros((5, c2), w3.dtype),
                           w3[3:], jnp.zeros((Cp - C, c2), w3.dtype)], axis=0)
    b3p = jnp.concatenate([b3[:3], jnp.zeros((5, 1), b3.dtype),
                           b3[3:], jnp.zeros((Cp - C, 1), b3.dtype)], axis=0)

    feats = seed_feats.astype(cdt)           # native (B, C, N) — no transpose
    w1c, w2c, w3c = w1.astype(cdt), w2.astype(cdt), w3p.astype(cdt)
    b1c, b2c, b3c = (b1.astype(jnp.float32), b2.astype(jnp.float32),
                     b3p.astype(jnp.float32))

    # Lane tile: multiple of 128, capped so double-buffered tiles fit VMEM
    # comfortably on v7x (64 MiB per TC).
    in_bytes = jnp.dtype(cdt).itemsize
    out_bytes = jnp.dtype(out_dtype).itemsize
    tn = _round_up(min(lane_tile, _round_up(N, 128)), 128)

    def tile_footprint(t):
        per_step = C * t * in_bytes + C * t * out_bytes + 8 * t * 4
        return 2 * per_step                  # double-buffered in/out streams

    while tn > 128 and tile_footprint(tn) > 24 * 1024 * 1024:
        tn = _round_up(tn // 2, 128)

    grid = (B, pl.cdiv(N, tn))

    def rep(shape):
        return pl.BlockSpec(shape, lambda b, t: (0, 0))

    in_specs = [
        pl.BlockSpec((pl.Squeezed(), C, tn), lambda b, t: (b, 0, t)),
        rep(w1c.shape), rep(b1c.shape),
        rep(w2c.shape), rep(b2c.shape),
        rep(w3c.shape), rep(b3c.shape),
    ]
    out_specs = (
        pl.BlockSpec((pl.Squeezed(), C, tn), lambda b, t: (b, 0, t)),
        pl.BlockSpec((pl.Squeezed(), 3, tn), lambda b, t: (b, 0, t)),
    )
    out_shape = (
        jax.ShapeDtypeStruct((B, C, N), out_dtype),
        jax.ShapeDtypeStruct((B, 3, N), jnp.float32),
    )

    flops = 2 * B * N * (C * c1 + c1 * c2 + c2 * (C + 3))
    bytes_accessed = (B * C * N * in_bytes            # feats in
                      + B * C * N * out_bytes         # vote_feats out
                      + B * 3 * N * 4                 # offset out
                      + (w1c.size + w2c.size + w3c.size) * in_bytes
                      + (b1c.size + b2c.size + b3c.size) * 4)
    cost = pl.CostEstimate(flops=int(flops), transcendentals=int(B * N),
                           bytes_accessed=int(bytes_accessed))

    vote_feats, offset = pl.pallas_call(
        vote_kernel,
        out_shape=out_shape,
        grid=grid,
        in_specs=in_specs,
        out_specs=out_specs,
        compiler_params=pltpu.CompilerParams(
            dimension_semantics=("parallel", "parallel"),
            vmem_limit_bytes=32 * 1024 * 1024,
        ),
        cost_estimate=cost,
    )(feats, w1c, b1c, w2c, b2c, w3c, b3c)

    # vote_xyz_range is None (module default): plain add, trivial in XLA.
    vote_points = seed_points + jnp.transpose(offset, (0, 2, 1)).astype(seed_points.dtype)
    return vote_points, vote_feats, offset


# -----------------------------------------------------------------------------
# Deterministic parameter construction (Conv1d k=1 + BN1d folded for eval)
# -----------------------------------------------------------------------------
def make_params(in_channels, conv_channels=(16, 16), seed=1):
    key = jax.random.PRNGKey(seed)
    eps = 1e-5

    def fold_bn(key, cin, cout):
        k1, k2, k3, k4, k5, k6 = jax.random.split(key, 6)
        w = 0.1 * jax.random.normal(k1, (cout, cin), jnp.float32)
        b = 0.05 * jax.random.normal(k2, (cout,), jnp.float32)
        gamma = 1.0 + 0.1 * jax.random.normal(k3, (cout,), jnp.float32)
        beta = 0.05 * jax.random.normal(k4, (cout,), jnp.float32)
        running_mean = 0.1 * jax.random.normal(k5, (cout,), jnp.float32)
        running_var = 1.0 + 0.1 * jax.random.uniform(k6, (cout,), jnp.float32)
        scale = gamma / jnp.sqrt(running_var + eps)
        w_f = w * scale[:, None]
        b_f = (b - running_mean) * scale + beta
        return w_f, b_f.reshape(cout, 1)

    k1, k2, k3 = jax.random.split(key, 3)
    w1, b1 = fold_bn(k1, in_channels, conv_channels[0])
    w2, b2 = fold_bn(k2, conv_channels[0], conv_channels[1])

    out_ch = 3 + in_channels      # (3 + C) * vote_per_seed, vote_per_seed = 1
    k3a, k3b = jax.random.split(k3)
    w3 = 0.1 * jax.random.normal(k3a, (out_ch, conv_channels[1]), jnp.float32)
    b3 = 0.05 * jax.random.normal(k3b, (out_ch, 1), jnp.float32)
    return (w1, b1, w2, b2, w3, b3)


# -----------------------------------------------------------------------------
# Pure-JAX reference (same math as the PyTorch forward) for validation
# -----------------------------------------------------------------------------
def reference_forward(seed_points, seed_feats, params):
    w1, b1, w2, b2, w3, b3 = params
    x = jnp.maximum(jnp.einsum('oc,bcn->bon', w1, seed_feats) + b1[None], 0.0)
    x = jnp.maximum(jnp.einsum('oc,bcn->bon', w2, x) + b2[None], 0.0)
    votes = jnp.einsum('oc,bcn->bon', w3, x) + b3[None]        # (B, 3+C, N)
    offset = votes[:, 0:3, :]                                  # (B, 3, N)
    res = votes[:, 3:, :]                                      # (B, C, N)
    vote_points = seed_points + jnp.transpose(offset, (0, 2, 1))
    vf = seed_feats + res
    norm = jnp.sqrt(jnp.sum(vf * vf, axis=1, keepdims=True))
    return vote_points, vf / norm, offset


if __name__ == "__main__":
    B, C, N = 2, 16, 128   # batch, in_channels, num_seed (vote_per_seed=1 -> M=N)

    key = jax.random.PRNGKey(0)
    kp, kf = jax.random.split(key)
    seed_points = jax.random.normal(kp, (B, N, 3), jnp.float32)
    seed_feats = jax.random.normal(kf, (B, C, N), jnp.float32)
    params = make_params(C)

    ref_vp, ref_vf, ref_off = reference_forward(seed_points, seed_feats, params)

    # Default (bf16 feats / MXU) path — looser tolerance for the truncation.
    vp, vf, off = jax.block_until_ready(
        vote_module_forward(seed_points, seed_feats, params))
    np.testing.assert_allclose(np.asarray(vp), np.asarray(ref_vp), rtol=5e-2, atol=5e-2)
    np.testing.assert_allclose(np.asarray(vf), np.asarray(ref_vf), rtol=5e-2, atol=5e-2)
    np.testing.assert_allclose(np.asarray(off), np.asarray(ref_off), rtol=5e-2, atol=5e-2)

    # Full-f32 path — tight numerical check against the reference.
    vp32, vf32, off32 = jax.block_until_ready(
        vote_module_forward(seed_points, seed_feats, params, use_bf16=False))
    np.testing.assert_allclose(np.asarray(vp32), np.asarray(ref_vp), rtol=1e-5, atol=1e-5)
    np.testing.assert_allclose(np.asarray(vf32), np.asarray(ref_vf), rtol=1e-5, atol=1e-5)
    np.testing.assert_allclose(np.asarray(off32), np.asarray(ref_off), rtol=1e-5, atol=1e-5)

    print("KERNEL_OK")
</pallas_src>

<mosaic_0001>
module attributes {stable_mosaic.version = 11 : i64} {
  func.func @vote_kernel(%arg0: i32, %arg1: i32, %arg2: memref<1x16x128xbf16, #tpu.memory_space<vmem>>, %arg3: memref<16x16xbf16, #tpu.memory_space<vmem>>, %arg4: memref<16x1xf32, #tpu.memory_space<vmem>>, %arg5: memref<16x16xbf16, #tpu.memory_space<vmem>>, %arg6: memref<16x1xf32, #tpu.memory_space<vmem>>, %arg7: memref<24x16xbf16, #tpu.memory_space<vmem>>, %arg8: memref<24x1xf32, #tpu.memory_space<vmem>>, %arg9: memref<1x16x128xf32, #tpu.memory_space<vmem>>, %arg10: memref<1x3x128xf32, #tpu.memory_space<vmem>>) attributes {dimension_semantics = [#tpu.dimension_semantics<parallel>, #tpu.dimension_semantics<parallel>], iteration_bounds = array<i64: 2, 1>, scalar_prefetch = 0 : i64, scratch_operands = 0 : i64, tpu.core_type = #tpu.core_type<tc>, window_params = [{transform_indices = @transform_0, window_bounds = array<i64: 1, 16, 128>}, {pipeline_mode = #tpu.pipeline_mode<synchronous>, transform_indices = @transform_1, window_bounds = array<i64: 16, 16>}, {pipeline_mode = #tpu.pipeline_mode<synchronous>, transform_indices = @transform_2, window_bounds = array<i64: 16, 1>}, {pipeline_mode = #tpu.pipeline_mode<synchronous>, transform_indices = @transform_3, window_bounds = array<i64: 16, 16>}, {pipeline_mode = #tpu.pipeline_mode<synchronous>, transform_indices = @transform_4, window_bounds = array<i64: 16, 1>}, {pipeline_mode = #tpu.pipeline_mode<synchronous>, transform_indices = @transform_5, window_bounds = array<i64: 24, 16>}, {pipeline_mode = #tpu.pipeline_mode<synchronous>, transform_indices = @transform_6, window_bounds = array<i64: 24, 1>}, {transform_indices = @transform_7, window_bounds = array<i64: 1, 16, 128>}, {transform_indices = @transform_8, window_bounds = array<i64: 1, 3, 128>}]} {
    %c0 = arith.constant 0 : index
    %c0_0 = arith.constant 0 : index
    %c0_1 = arith.constant 0 : index
    %0 = vector.load %arg2[%c0, %c0_0, %c0_1] : memref<1x16x128xbf16, #tpu.memory_space<vmem>>, vector<1x16x128xbf16>
    %1 = vector.shape_cast %0 : vector<1x16x128xbf16> to vector<16x128xbf16>
    %c0_2 = arith.constant 0 : index
    %c0_3 = arith.constant 0 : index
    %2 = vector.load %arg3[%c0_2, %c0_3] : memref<16x16xbf16, #tpu.memory_space<vmem>>, vector<16x16xbf16>
    %cst = arith.constant dense<0.000000e+00> : vector<16x128xf32>
    %3 = tpu.matmul %2, %1, %cst {dimension_numbers = #tpu.dot_dimension_numbers<[1], [0], [0], [1], [0, 0, 1, 1], [], []>} : vector<16x16xbf16>, vector<16x128xbf16>, vector<16x128xf32> -> vector<16x128xf32>
    %c0_4 = arith.constant 0 : index
    %c0_5 = arith.constant 0 : index
    %4 = vector.load %arg4[%c0_4, %c0_5] : memref<16x1xf32, #tpu.memory_space<vmem>>, vector<16x1xf32>
    %5 = vector.broadcast %4 : vector<16x1xf32> to vector<16x128xf32>
    %6 = arith.addf %3, %5 : vector<16x128xf32>
    %cst_6 = arith.constant 0.000000e+00 : f32
    %7 = vector.broadcast %cst_6 : f32 to vector<16x128xf32>
    %8 = arith.maximumf %6, %7 : vector<16x128xf32>
    %c0_7 = arith.constant 0 : index
    %c0_8 = arith.constant 0 : index
    %9 = vector.load %arg5[%c0_7, %c0_8] : memref<16x16xbf16, #tpu.memory_space<vmem>>, vector<16x16xbf16>
    %10 = arith.truncf %8 : vector<16x128xf32> to vector<16x128xbf16>
    %cst_9 = arith.constant dense<0.000000e+00> : vector<16x128xf32>
    %11 = tpu.matmul %9, %10, %cst_9 {dimension_numbers = #tpu.dot_dimension_numbers<[1], [0], [0], [1], [0, 0, 1, 1], [], []>} : vector<16x16xbf16>, vector<16x128xbf16>, vector<16x128xf32> -> vector<16x128xf32>
    %c0_10 = arith.constant 0 : index
    %c0_11 = arith.constant 0 : index
    %12 = vector.load %arg6[%c0_10, %c0_11] : memref<16x1xf32, #tpu.memory_space<vmem>>, vector<16x1xf32>
    %13 = vector.broadcast %12 : vector<16x1xf32> to vector<16x128xf32>
    %14 = arith.addf %11, %13 : vector<16x128xf32>
    %cst_12 = arith.constant 0.000000e+00 : f32
    %15 = vector.broadcast %cst_12 : f32 to vector<16x128xf32>
    %16 = arith.maximumf %14, %15 : vector<16x128xf32>
    %c0_13 = arith.constant 0 : index
    %c0_14 = arith.constant 0 : index
    %17 = vector.load %arg7[%c0_13, %c0_14] : memref<24x16xbf16, #tpu.memory_space<vmem>>, vector<24x16xbf16>
    %18 = arith.truncf %16 : vector<16x128xf32> to vector<16x128xbf16>
    %cst_15 = arith.constant dense<0.000000e+00> : vector<24x128xf32>
    %19 = tpu.matmul %17, %18, %cst_15 {dimension_numbers = #tpu.dot_dimension_numbers<[1], [0], [0], [1], [0, 0, 1, 1], [], []>} : vector<24x16xbf16>, vector<16x128xbf16>, vector<24x128xf32> -> vector<24x128xf32>
    %c0_16 = arith.constant 0 : index
    %c0_17 = arith.constant 0 : index
    %20 = vector.load %arg8[%c0_16, %c0_17] : memref<24x1xf32, #tpu.memory_space<vmem>>, vector<24x1xf32>
    %21 = vector.broadcast %20 : vector<24x1xf32> to vector<24x128xf32>
    %22 = arith.addf %19, %21 : vector<24x128xf32>
    %23 = vector.extract_strided_slice %22 {offsets = [0, 0], sizes = [3, 128], strides = [1, 1]} : vector<24x128xf32> to vector<3x128xf32>
    %c0_18 = arith.constant 0 : index
    %c0_19 = arith.constant 0 : index
    %c0_20 = arith.constant 0 : index
    %24 = vector.load %arg10[%c0_18, %c0_19, %c0_20] : memref<1x3x128xf32, #tpu.memory_space<vmem>>, vector<1x3x128xf32>
    %25 = vector.shape_cast %24 : vector<1x3x128xf32> to vector<3x128xf32>
    %26 = vector.shape_cast %23 : vector<3x128xf32> to vector<1x3x128xf32>
    tpu.vector_store %arg10[%c0_18, %c0_19, %c0_20], %26 {strides = array<i32>} : memref<1x3x128xf32, #tpu.memory_space<vmem>>, vector<1x3x128xf32>,
    %27 = vector.extract_strided_slice %22 {offsets = [8, 0], sizes = [16, 128], strides = [1, 1]} : vector<24x128xf32> to vector<16x128xf32>
    %28 = arith.extf %1 : vector<16x128xbf16> to vector<16x128xf32>
    %29 = arith.addf %28, %27 : vector<16x128xf32>
    %30 = arith.mulf %29, %29 : vector<16x128xf32>
    %cst_21 = arith.constant dense<0.000000e+00> : vector<128xf32>
    %31 = vector.multi_reduction <add>, %30, %cst_21 [0] : vector<16x128xf32> to vector<128xf32>
    %32 = vector.shape_cast %31 : vector<128xf32> to vector<1x128xf32>
    %cst_22 = arith.constant 9.99999996E-13 : f32
    %33 = vector.broadcast %cst_22 : f32 to vector<1x128xf32>
    %34 = arith.addf %32, %33 : vector<1x128xf32>
    %35 = math.rsqrt %34 : vector<1x128xf32>
    %36 = vector.broadcast %35 : vector<1x128xf32> to vector<16x128xf32>
    %37 = arith.mulf %29, %36 : vector<16x128xf32>
    %c0_23 = arith.constant 0 : index
    %c0_24 = arith.constant 0 : index
    %c0_25 = arith.constant 0 : index
    %38 = vector.load %arg9[%c0_23, %c0_24, %c0_25] : memref<1x16x128xf32, #tpu.memory_space<vmem>>, vector<1x16x128xf32>
    %39 = vector.shape_cast %38 : vector<1x16x128xf32> to vector<16x128xf32>
    %40 = vector.shape_cast %37 : vector<16x128xf32> to vector<1x16x128xf32>
    tpu.vector_store %arg9[%c0_23, %c0_24, %c0_25], %40 {strides = array<i32>} : memref<1x16x128xf32, #tpu.memory_space<vmem>>, vector<1x16x128xf32>,
    return
  }
  func.func @transform_0(%arg0: i32, %arg1: i32) -> (i32, i32, i32) {
    %c0_i32 = arith.constant 0 : i32
    %c0_i32_0 = arith.constant 0 : i32
    return %arg0, %c0_i32, %arg1 : i32, i32, i32
  }
  func.func @transform_1(%arg0: i32, %arg1: i32) -> (i32, i32) {
    %c0_i32 = arith.constant 0 : i32
    %c0_i32_0 = arith.constant 0 : i32
    %c0_i32_1 = arith.constant 0 : i32
    return %c0_i32, %c0_i32_0 : i32, i32
  }
  func.func @transform_2(%arg0: i32, %arg1: i32) -> (i32, i32) {
    %c0_i32 = arith.constant 0 : i32
    %c0_i32_0 = arith.constant 0 : i32
    %c0_i32_1 = arith.constant 0 : i32
    return %c0_i32, %c0_i32_0 : i32, i32
  }
  func.func @transform_3(%arg0: i32, %arg1: i32) -> (i32, i32) {
    %c0_i32 = arith.constant 0 : i32
    %c0_i32_0 = arith.constant 0 : i32
    %c0_i32_1 = arith.constant 0 : i32
    return %c0_i32, %c0_i32_0 : i32, i32
  }
  func.func @transform_4(%arg0: i32, %arg1: i32) -> (i32, i32) {
    %c0_i32 = arith.constant 0 : i32
    %c0_i32_0 = arith.constant 0 : i32
    %c0_i32_1 = arith.constant 0 : i32
    return %c0_i32, %c0_i32_0 : i32, i32
  }
  func.func @transform_5(%arg0: i32, %arg1: i32) -> (i32, i32) {
    %c0_i32 = arith.constant 0 : i32
    %c0_i32_0 = arith.constant 0 : i32
    %c0_i32_1 = arith.constant 0 : i32
    return %c0_i32, %c0_i32_0 : i32, i32
  }
  func.func @transform_6(%arg0: i32, %arg1: i32) -> (i32, i32) {
    %c0_i32 = arith.constant 0 : i32
    %c0_i32_0 = arith.constant 0 : i32
    %c0_i32_1 = arith.constant 0 : i32
    return %c0_i32, %c0_i32_0 : i32, i32
  }
  func.func @transform_7(%arg0: i32, %arg1: i32) -> (i32, i32, i32) {
    %c0_i32 = arith.constant 0 : i32
    %c0_i32_0 = arith.constant 0 : i32
    return %arg0, %c0_i32, %arg1 : i32, i32, i32
  }
  func.func @transform_8(%arg0: i32, %arg1: i32) -> (i32, i32, i32) {
    %c0_i32 = arith.constant 0 : i32
    %c0_i32_0 = arith.constant 0 : i32
    return %arg0, %c0_i32, %arg1 : i32, i32, i32
  }
}

</mosaic_0001>

<bundles_post_ra>
// kernel: tpu_custom_call.1
= control target key start
LH: loop header
LB: loop body
LE: loop exit
PB: predicated region body
PF: predicated region fallthrough
CT: control target
= control target key end

     0   :  { %14 = vsyncpa [#allocation3], 0  ;;  %s1031_s0 = inlined_call_operand.vmem [shape: bf16[2,16,128], index: 0, kind: input, shape index: {}]   ;;  %s1032_s1 = inlined_call_operand.vmem [shape: bf16[16,16], index: 1, kind: input, shape index: {}]   ;;  %s1033_s2 = inlined_call_operand.vmem [shape: f32[16,1], index: 2, kind: input, shape index: {}]   ;;  %s1034_s3 = inlined_call_operand.vmem [shape: bf16[16,16], index: 3, kind: input, shape index: {}]   ;;  %s1035_s4 = inlined_call_operand.vmem [shape: f32[16,1], index: 4, kind: input, shape index: {}]   ;;  %s1036_s5 = inlined_call_operand.vmem [shape: bf16[24,16], index: 5, kind: input, shape index: {}]   ;;  %s1037_s6 = inlined_call_operand.vmem [shape: f32[24,1], index: 6, kind: input, shape index: {}]   ;;  %s1038_s7 = inlined_call_operand.hbm [shape: f32[2,16,128], index: 7, kind: output, shape index: {0}]   ;;  %s1039_s8 = inlined_call_operand.vmem [shape: f32[2,3,128], index: 8, kind: output, shape index: {1}]  }
   0x1   :  { %16 = vsyncpa [#allocation3 + $0x1], 0  ;;  %s886_s27 = smov 0   ;;  %s888_s28 = smov 0  }
   0x2   :  { %s890_s29 = smov 0   ;;  %s892_s30 = smov 0  }
   0x3   :  { %s894_s9 = smov 0   ;;  %s896_s10 = smov 0  }
   0x4 LB: > { %s654_s11 = sadd.s32 4294967295, %s836_s10   ;;  %s655_s12 = sadd.s32 4294967294, %s836_s10   ;;  %s836_s10 = sphi %s896_s10, %s22_s10   ;;  %s832_s9 = sphi %s894_s9, %s1046_s9   ;;  %s828_s30 = sphi %s892_s30, %s1045_s30   ;;  %s824_s29 = sphi %s890_s29, %s1044_s29   ;;  %s820_s28 = sphi %s888_s28, %s1043_s28   ;;  %s816_s27 = sphi %s886_s27, %s1042_s27  }
   0x5   : > { %s34_s13 = sadd.s32 1, %s832_s9  ;;  %s197_s14 = sadd.s32 1, %s824_s29 }
   0x6   : > { %p36_p0 = scmp.ge.s32.totalorder %s34_s13, 2  ;;  %p207_p1 = scmp.ne.s32.totalorder %s824_s29, %s820_s28 }
   0x7   : > { %p208_p2 = scmp.eq.s32.totalorder %s654_s11, 1  ;;  %p213_p3 = scmp.ne.s32.totalorder %s820_s28, %s816_s27 }
   0x8   : > { %s1048_s13 = smov (%p36_p0, %s34_s13), 0  ;;  %p214_p5 = scmp.eq.s32.totalorder %s655_s12, 1 }
   0x9   : > { %p926_p4 = por %p208_p2, %p207_p1  ;;  %s192_s16 = ssub.s32 %s832_s9, %s1048_s13 }
   0xa   : > { %p658_p6 = scmp.ge.s32.totalorder %s836_s10, 1  ;;  %p195_p7 = scmp.eq.s32.totalorder %s192_s16, 0 }
   0xb   : > { %p933_p8 = por %p214_p5, %p213_p3  ;;  %p289_p9 = scmp.lt.s32.totalorder %s836_s10, 3 }
   0xc   : > { %s939_s18 = scalar_select %p195_p7, %s824_s29, %s197_s14  }
   0xd   : > { %p290_p10 = pnand %p658_p6, %p289_p9 }
   0xe   : > { %p333_p11 = scmp.lt.s32.totalorder (!%p290_p10), %s828_s30, 1  ;;  %s693_s16 = sshll.u32 (!%p290_p10), %s828_s30, 4 }
   0xf   : > { %293 = sbr.rel (%p290_p10) target bundleno = 501 (0x1f5), region = 48 }
  0x14   : > { %v353_v0 = vld [vmem:[%s1033_s2] sm:$0xff]  ;;  %v838_v1 = vmov 0   ;;  %s946_s21 = scalar_select %p333_p11, %s828_s30, 1  ;;  %v354_v4 = vld [vmem:[%s1033_s2 + $0x8] sm:$0xff]  ;;  %vm376_vm0 = vcmask 130048   ;;  %v441_v19 = vld [vmem:[%s1037_s6 + $0x10] sm:$0xff] }
  0x15   : > { %753 = vset.pattern.permute.xlu0 %v838_v1  ;;  %754 = vset.pattern.permute.xlu1 %v838_v1  ;;  %v690_v3 = vld [vmem:[%s1032_s1] sm:$0xff]  ;;  %v400_v7 = vld [vmem:[%s1035_s4 + $0x8] sm:$0xff] }
  0x16   : > { %357 = vperm.xlu0 %753, %v353_v0   ;;  %755 = vset.pattern.permute.xlu2 %v838_v1  ;;  %s688_s22 = sshll.u32 %s946_s21, 3  ;;  %v439_v5 = vld [vmem:[%s1037_s6] sm:$0xff]  ;;  %v440_v18 = vld [vmem:[%s1037_s6 + $0x8] sm:$0xff]  ;;  %s662_s26 = sshll.u32 %s946_s21, 2 }
  0x17   : > { %s952_s25 = scalar_lea.vmem %s1031_s0, %s688_s22  ;;  %v399_v6 = vld [vmem:[%s1035_s4] sm:$0xff]  ;;  %449 = vperm.xlu2 %755, %v440_v18   ;;  %v437_v23 = vld [vmem:[%s1036_s5 + $0x8] sm:$0xf]  ;;  %s347_s14 = scalar_lea.vmem %s1039_s8, %s662_s26 }
  0x18   : > { %v689_v2 = vld [vmem:[%s952_s25] sm:$0xff]  ;;  %403 = vperm.xlu1 %754, %v399_v6   ;;  %v462_v27 = vunpack.c.l.b16 %v437_v23  ;;  %s321_s21 = sand.u32 1, %s820_s28   ;;  %s538_s22 = scalar_lea.hbm %s1038_s7, %s693_s16 }
  0x19   : > { %387 = vmatpush.bf16.msra.mxu0 %v689_v2  ;;  %v691_v17 = vld [vmem:[%s1034_s3] sm:$0xff]  ;;  %s541_s26 = sshll.u32 %s538_s22, 4  ;;  %s519_s30 = scalar_lea.sflag [#allocation3], %s321_s21  ;;  %s542_s26 = int_to_ptr.hbm [resolvable:$true] %s541_s26 }
  0x1a   : > { %v692_v31 = vld [vmem:[%s1036_s5] sm:$0xff]  ;;  %v464_v32 = vpack.c.b16 %v462_v27, %v462_v27  ;;  %s772_s11 = sshra.s32 %s542_s26, 4  ;;  %s778_s16 = scalar_lea.hbm %s1038_s7, 32  ;;  %s773_s11 = int_to_ptr.hbm [resolvable:$true] %s772_s11 }
  0x1b   : > { %v350_v39 = vld [vmem:[%s952_s25] sm:$0xff]   ;;  %s659_s25 = sshll.u32 %s321_s21, 4  ;;  %s774_s12 = scalar_lea.hbm %s773_s11, 16 }
  0x1c   : > { %671 = vmatmul.msk.bf16.vlgmr.msra.gmra.mxu0 %vm376_vm0, %v690_v3  ;;  %v491_v41 = vunpack.c.h.bf16 %v350_v39  ;;  %v490_v42 = vunpack.c.l.bf16 %v350_v39  ;;  %s323_s23 = scalar_lea.vmem [#allocation2], %s659_s25  ;;  %p775_p12 = scmp.ne.s32.totalorder %s773_s11, %s774_s12 }
  0x1d   : > { %s539_s24 = sshll.u32 %s323_s23, 4  ;;  %p779_p1 = scmp.lt.s32.totalorder %s773_s11, %s1038_s7  ;;  %s540_s24 = int_to_ptr.vmem [resolvable:$true] %s539_s24 }
  0x1e   : > { %362 = vperm.xlu0 %753, %v354_v4   ;;  %p776_p13 = pnand %p775_p12, %p926_p4  ;;  %p780_p2 = scmp.lt.s32.totalorder %s778_s16, %s774_s12 }
  0x1f   : > { %454 = vperm.xlu2 %755, %v441_v19  }
  0x20   : > { %408 = vperm.xlu1 %754, %v400_v7   ;;  %p777_p0 = pneg %p776_p13  ;;  %p781_p3 = por %p780_p2, %p779_p1 }
  0x22   : > { %p782_p5 = pnand %p781_p3, %p777_p0 }
  0x26   : > { %444 = vperm.xlu0 %753, %v439_v5  }
  0x71   : > { %v450_v33 = vpop.permute.xlu2 %449 }
  0x79   : > { %v455_v38 = vpop.permute.xlu2 %454 }
  0x88   : > { %v358_v8 = vpop.permute.xlu0 %357 }
  0x8a   : > { %v404_v20 = vpop.permute.xlu1 %403 }
  0x90   : > { %v363_v11 = vpop.permute.xlu0 %362 }
  0x92   : > { %v409_v24 = vpop.permute.xlu1 %408 }
  0x98   : > { %v445_v34 = vpop.permute.xlu0 %444 }
  0x99   : > { %v389_v9 = vpop.f32.mrf.mxu0 }
  0x9a   : > { %v390_v10 = vadd.f32 %v389_v9, %v358_v8 }
  0x9c   : > { %v394_v14 = vmax.f32 %v390_v10, 0.0 }
  0xa1   : > { %v391_v12 = vpop.f32.mrf.mxu0 }
  0xa2   : > { %v392_v13 = vadd.f32 %v391_v12, %v363_v11 }
  0xa4   : > { %v395_v15 = vmax.f32 %v392_v13, 0.0 }
  0xa6   : > { %v398_v16 = vpack.c.bf16 %v395_v15, %v394_v14 }
  0xa8   : > { %426 = vmatpush.bf16.msra.mxu1 %v398_v16 }
  0xab   : > { %676 = vmatmul.msk.bf16.vlgmr.msra.gmra.mxu1 %vm376_vm0, %v691_v17 }
 0x128   : > { %v428_v21 = vpop.f32.mrf.mxu1 }
 0x129   : > { %v429_v22 = vadd.f32 %v428_v21, %v404_v20 }
 0x12b   : > { %v433_v28 = vmax.f32 %v429_v22, 0.0 }
 0x130   : > { %v430_v25 = vpop.f32.mrf.mxu1 }
 0x131   : > { %v431_v26 = vadd.f32 %v430_v25, %v409_v24 }
 0x133   : > { %v434_v29 = vmax.f32 %v431_v26, 0.0 }
 0x135   : > { %v438_v30 = vpack.c.bf16 %v434_v29, %v433_v28 }
 0x137   : > { %478 = vmatpush.bf16.msra.mxu2 %v438_v30  ;;  %694 = vmatpush.bf16.msra.mxu3 %v438_v30 }
 0x13a   : > { %681 = vmatmul.msk.bf16.vlgmr.msra.gmra.mxu2 %vm376_vm0, %v692_v31  ;;  %682 = vmatmul.msk.bf16.vlgmr.msra.gmra.mxu3 %vm376_vm0, %v464_v32 }
 0x1bd   : > { %v480_v35 = vpop.f32.mrf.mxu2  ;;  %v485_v36 = vpop.f32.mrf.mxu3 }
 0x1be   : > { %v481_v37 = vadd.f32 %v480_v35, %v445_v34  ;;  %v486_v40 = vadd.f32 %v485_v36, %v455_v38 }
 0x1c0   : > { %489 = vst [vmem:[%s347_s14] sm:$0x7] %v481_v37  ;;  %v493_v45 = vadd.f32 %v491_v41, %v486_v40 }
 0x1c2   : > { %v495_v48 = vmul.f32 %v493_v45, %v493_v45 }
 0x1c5   : > { %v482_v43 = vpop.f32.mrf.mxu2  ;;  %v487_v44 = vpop.f32.mrf.mxu3 }
 0x1c6   : > { %v483_v46 = vadd.f32 %v482_v43, %v450_v33 }
 0x1c8   : > { %v492_v47 = vadd.f32 %v490_v42, %v483_v46 }
 0x1ca   : > { %v494_v49 = vmul.f32 %v492_v47, %v492_v47 }
 0x1cc   : > { %v496_v50 = vadd.f32 %v495_v48, %v494_v49 }
 0x1ce   : > { %v497_v51 = vrot.slane %v496_v50, 4 }
 0x1d0   : > { %v498_v52 = vadd.f32 %v497_v51, %v496_v50 }
 0x1d2   : > { %v499_v53 = vrot.slane %v498_v52, 2 }
 0x1d4   : > { %v500_v54 = vadd.f32 %v499_v53, %v498_v52 }
 0x1d6   : > { %v501_v55 = vrot.slane %v500_v54, 1 }
 0x1d8   : > { %v502_v56 = vadd.f32 %v501_v55, %v500_v54 }
 0x1da   : > { %v503_v57 = vadd.f32 1e-12, %v502_v56 }
 0x1dc   : > { %756 = vrsqrt.f32 %v503_v57  ;;  %vm510_vm2 = vweird.f32 %v503_v57 }
 0x1e2   : > { %v757_v58 = vpop.eup %756 }
 0x1e3   : > { %v505_v59 = vmul.f32 %v757_v58, %v503_v57  ;;  %vm511_vm1 = vweird.f32 %v757_v58 }
 0x1e4   : > { %vm512_vm3 = vmor %vm510_vm2, %vm511_vm1 }
 0x1e5   : > { %v506_v60 = vmul.f32 %v757_v58, %v505_v59 }
 0x1e7   : > { %v507_v61 = vmul.f32 0.5, %v506_v60 }
 0x1e9   : > { %v508_v62 = vsub.f32 1.5, %v507_v61 }
 0x1eb   : > { %v509_v63 = vmul.f32 %v757_v58, %v508_v62 }
 0x1ed   : > { %v513_v0 = vsel %vm512_vm3, %v757_v58, %v509_v63 }
 0x1ee   : > { %v514_v1 = vmul.f32 %v513_v0, %v492_v47  ;;  %v515_v2 = vmul.f32 %v513_v0, %v493_v45 }
 0x1f0   : > { %516 = vst [vmem:[%s323_s23] sm:$0xff] %v514_v1 }
 0x1f1   : > { %517 = vst [vmem:[%s323_s23 + $0x8] sm:$0xff] %v515_v2 }
 0x1f2   : > { %785 = shalt.err (!%p782_p5)
}
 0x1f3   : > { %s839_s21 = smov 128   ;;  %s840_s22 = smov 8  }
 0x1f4   : > { %695 = dma.vmem_to_hbm [thread:$0]  (%p926_p4), %s540_s24, 256, %s542_s26, %s519_s30, %s839_s21, %s839_s21, %s840_s22  }
 0x1f5 PF: > { %p701_p6 = scmp.ge.s32.totalorder %s836_s10, 2  ;;  %s559_s23 = sand.u32 1, %s816_s27  }
 0x1f6   : > { %s560_s14 = scalar_lea.sflag [#allocation3], %s559_s23 }
 0x1f7   : > { %p698_p7 = pnand %p701_p6, %p933_p8 }
 0x1f9   : > { %p699_p9 = pneg %p698_p7 }
 0x1fb   : > { %811 = dma.done.wait (%p699_p9), %s560_s14, 256  }
 0x1fc   : > { %813 = vsyncadd (%p699_p9), %s560_s14, 4294967040  ;;  %s22_s10 = sadd.s32 1, %s836_s10   ;;  %s1042_s27 = smov %s820_s28 }
 0x1fd   : > { %p19_p10 = scmp.ge.s32.totalorder %s22_s10, 4   ;;  %s1043_s28 = smov %s824_s29 }
 0x1fe   : > { %s1044_s29 = smov %s939_s18  ;;  %s1045_s30 = smov %s832_s9 }
 0x1ff   : > { %s1046_s9 = smov %s1048_s13  ;;  %21 = sbr.rel (!%p19_p10) target bundleno = 4 (0x4), region = 95 }
 0x204   :  { %576 = vsyncpa [#allocation3], 1 }
 0x205   :  { %578 = vsyncpa [#allocation3 + $0x1], 1 }

</bundles_post_ra>
